<compile_context>
chip_gen: v7x
topology: tpu7x:2x2x1
jax: 0.10.0
libtpu: 0.0.40
codegen_flags: <defaults>
</compile_context>

<pallas_src>
import functools

import jax
import jax.numpy as jnp
from jax.experimental import pallas as pl
from jax.experimental.pallas import tpu as pltpu  # noqa: F401  (TPU backend)

LANE = 128  # vreg lane width; Q/K/V segments are zero-padded to this


def encoder_kernel(x_ref, wqkv_ref, bqkv_ref, w1_ref, wsec_ref, brest_ref,
                   o_ref, *, batch, seq, emb):
    """Single-invocation whole-slab kernel (no grid).

    x_ref     : (B*S, E)
    wqkv_ref  : (E, 3*128)   [wq*scale | 0][wk | 0][wv | 0]   (lane-aligned)
    bqkv_ref  : (1, 3*128)   matching zero-padded biases
    w1_ref    : (E, 128)
    wsec_ref  : (2, 128, E)  [0] = wo zero-padded to 128 rows, [1] = w2
    brest_ref : (3, 128)     rows: bo|pad, b1, b2|pad
    o_ref     : (B*S, E)
    """
    bs = batch * seq
    x = x_ref[...]                                             # (B*S, E)

    # ---- fused, lane-aligned Q|K|V projection (one MXU weight load) ----
    qkv = jnp.dot(x, wqkv_ref[...],
                  preferred_element_type=jnp.float32) + bqkv_ref[...]
    # Slices fall on 128-lane vreg boundaries -> no relayout.  Padded columns
    # are exactly zero (zero weight + zero bias padding).
    q = qkv[:, 0 * LANE:1 * LANE].reshape(batch, seq, LANE)    # scale folded
    k = qkv[:, 1 * LANE:2 * LANE].reshape(batch, seq, LANE)
    v = qkv[:, 2 * LANE:3 * LANE].reshape(batch, seq, LANE)

    # ---- attention scores: contract last dims directly (no explicit k.T;
    # verify with pl.lower_as_mlir if this ever becomes XLU-bound) ----
    s = jnp.einsum('bqd,bkd->bqk', q, k,
                   preferred_element_type=jnp.float32)
    # numerically stable softmax; exact reciprocal (EUP) per correctness note
    s = s - jnp.max(s, axis=-1, keepdims=True)
    e = jnp.exp(s)
    a = e * pl.reciprocal(jnp.sum(e, axis=-1, keepdims=True), approx=False)
    # dropout(p=0.1) -> identity in eval mode

    h = jnp.einsum('bqk,bkd->bqd', a, v,
                   preferred_element_type=jnp.float32)         # (B,S,128)
    h2 = h.reshape(bs, LANE)                                   # cols >=V zero

    # Output projection: wo rows >= value_size are zero, so the zero-padded
    # columns of h2 contribute nothing.
    attn = jnp.dot(h2, wsec_ref[0],
                   preferred_element_type=jnp.float32) + brest_ref[0:1, :emb]

    # ---- MLP ----
    y = jnp.dot(attn, w1_ref[...],
                preferred_element_type=jnp.float32) + brest_ref[1:2, :]
    # dropout(p=0.1) -> identity in eval mode
    y = jnp.maximum(y, 0.0)                                    # ReLU
    out = jnp.dot(y, wsec_ref[1],
                  preferred_element_type=jnp.float32) + brest_ref[2:3, :emb]

    o_ref[...] = out.astype(o_ref.dtype)
    # TODO(synk): at realistic E/S, present a lane-dense output slab and cast
    # MXU operands to bf16 (keep preferred_element_type=f32).


@jax.jit
def encoder_forward(x, packed):
    """x: (B, S, E) float32. packed: dict from prepare_params (prep'd once)."""
    B, S, E = x.shape
    x2d = x.reshape(B * S, E)          # metadata-only, outside the kernel
    kernel = functools.partial(encoder_kernel, batch=B, seq=S, emb=E)
    # Single invocation, no grid: all operands (< 300 KiB total) live in VMEM
    # via the default (whole-array) specs.
    # TODO(synk): when B*S / S grow, add a batch/query-tile grid with
    # dimension_semantics=("parallel", ...) (v7x has 2 TensorCores) and
    # flash-style KV tiling before the S^2 term approaches the VMEM budget
    # (raise vmem_limit_bytes on v5e's 16 MiB scoped default if tiling later).
    out2d = pl.pallas_call(
        kernel,
        out_shape=jax.ShapeDtypeStruct((B * S, E), x.dtype),
    )(x2d, packed["wqkv"], packed["bqkv"], packed["w1"], packed["wsec"],
      packed["brest"])
    return out2d.reshape(B, S, E)


def prepare_params(p, *, embedding_size, key_query_size, value_size,
                   hidden=128):
    """One-time packing of PyTorch-style params into lane-aligned buffers.

    Runs once at init -- NOT on the per-call path.
    """
    E, KQ, V, H = embedding_size, key_query_size, value_size, hidden
    assert KQ <= LANE and V <= LANE and E <= LANE and H == LANE
    scale = 1.0 / (KQ ** 0.5)          # folded into the Q projection (exact)

    def pad_cols(w, width):
        return jnp.pad(w, ((0, 0), (0, width - w.shape[1])))

    wqkv = jnp.concatenate([pad_cols(p["wq"] * scale, LANE),
                            pad_cols(p["wk"], LANE),
                            pad_cols(p["wv"], LANE)], axis=1)   # (E, 384)
    bqkv = jnp.concatenate([pad_cols(p["bq"] * scale, LANE),
                            pad_cols(p["bk"], LANE),
                            pad_cols(p["bv"], LANE)], axis=1)   # (1, 384)
    wo_pad = jnp.pad(p["wo"], ((0, LANE - V), (0, 0)))          # (128, E)
    wsec = jnp.stack([wo_pad, p["w2"]], axis=0)                 # (2, 128, E)
    brest = jnp.concatenate([pad_cols(p["bo"], LANE),
                             pad_cols(p["b1"], LANE),
                             pad_cols(p["b2"], LANE)], axis=0)  # (3, 128)
    return dict(wqkv=wqkv, bqkv=bqkv, w1=p["w1"], wsec=wsec, brest=brest)


def init_params(key, embedding_size, key_query_size, value_size, hidden=128):
    """Deterministic PyTorch-Linear-style init; weights stored transposed
    as (in_features, out_features), biases as (1, out_features)."""
    def linear(k, fan_in, fan_out):
        k1, k2 = jax.random.split(k)
        bound = 1.0 / (fan_in ** 0.5)
        w = jax.random.uniform(k1, (fan_in, fan_out), jnp.float32, -bound, bound)
        b = jax.random.uniform(k2, (1, fan_out), jnp.float32, -bound, bound)
        return w, b

    keys = jax.random.split(key, 6)
    wq, bq = linear(keys[0], embedding_size, key_query_size)
    wk, bk = linear(keys[1], embedding_size, key_query_size)
    wv, bv = linear(keys[2], embedding_size, value_size)
    wo, bo = linear(keys[3], value_size, embedding_size)
    w1, b1 = linear(keys[4], embedding_size, hidden)
    w2, b2 = linear(keys[5], hidden, embedding_size)
    return dict(wq=wq, bq=bq, wk=wk, bk=bk, wv=wv, bv=bv,
                wo=wo, bo=bo, w1=w1, b1=b1, w2=w2, b2=b2)


def encoder_reference(x, p):
    """Pure-JAX reference of the PyTorch forward (eval mode)."""
    q = x @ p["wq"] + p["bq"]
    k = x @ p["wk"] + p["bk"]
    a = (q @ jnp.swapaxes(k, -2, -1)) / (k.shape[-1] ** 0.5)
    a = jax.nn.softmax(a, axis=-1)
    v = x @ p["wv"] + p["bv"]
    h = a @ v
    attn = h @ p["wo"] + p["bo"]
    y = jnp.maximum(attn @ p["w1"] + p["b1"], 0.0)
    return y @ p["w2"] + p["b2"]


if __name__ == "__main__":
    # hyperparameters implied by the module
    B, S, E = 2, 8, 32
    KQ, V = 16, 16

    key = jax.random.PRNGKey(0)
    kx, kp = jax.random.split(key)
    x = jax.random.normal(kx, (B, S, E), dtype=jnp.float32)
    params = init_params(kp, E, KQ, V)

    # One-time parameter packing (fusion / padding / scale fold) at init.
    packed = prepare_params(params, embedding_size=E, key_query_size=KQ,
                            value_size=V)
    packed = jax.tree_util.tree_map(jax.block_until_ready, packed)

    out = encoder_forward(x, packed)
    out = jax.block_until_ready(out)

    ref = encoder_reference(x, params)
    assert out.shape == (B, S, E)
    # Tolerance covers differing MXU accumulation order vs the XLA reference.
    assert jnp.allclose(out, ref, atol=1e-3, rtol=1e-3), (
        f"max abs err {jnp.max(jnp.abs(out - ref))}")

    print("KERNEL_OK")
</pallas_src>

<mosaic_0001>
module attributes {stable_mosaic.version = 11 : i64} {
  func.func @encoder_kernel(%arg0: memref<16x32xf32, #tpu.memory_space<vmem>>, %arg1: memref<32x384xf32, #tpu.memory_space<vmem>>, %arg2: memref<1x384xf32, #tpu.memory_space<vmem>>, %arg3: memref<32x128xf32, #tpu.memory_space<vmem>>, %arg4: memref<2x128x32xf32, #tpu.memory_space<vmem>>, %arg5: memref<3x128xf32, #tpu.memory_space<vmem>>, %arg6: memref<16x32xf32, #tpu.memory_space<vmem>>) attributes {dimension_semantics = [], scalar_prefetch = 0 : i64, scratch_operands = 0 : i64, tpu.core_type = #tpu.core_type<tc>} {
    %c0 = arith.constant 0 : index
    %c0_0 = arith.constant 0 : index
    %0 = vector.load %arg0[%c0, %c0_0] : memref<16x32xf32, #tpu.memory_space<vmem>>, vector<16x32xf32>
    %c0_1 = arith.constant 0 : index
    %c0_2 = arith.constant 0 : index
    %1 = vector.load %arg1[%c0_1, %c0_2] : memref<32x384xf32, #tpu.memory_space<vmem>>, vector<32x384xf32>
    %cst = arith.constant dense<0.000000e+00> : vector<16x384xf32>
    %2 = tpu.matmul %0, %1, %cst {dimension_numbers = #tpu.dot_dimension_numbers<[1], [0], [0], [1], [0, 0, 1, 1], [], []>} : vector<16x32xf32>, vector<32x384xf32>, vector<16x384xf32> -> vector<16x384xf32>
    %c0_3 = arith.constant 0 : index
    %c0_4 = arith.constant 0 : index
    %3 = vector.load %arg2[%c0_3, %c0_4] : memref<1x384xf32, #tpu.memory_space<vmem>>, vector<1x384xf32>
    %4 = vector.broadcast %3 : vector<1x384xf32> to vector<16x384xf32>
    %5 = arith.addf %2, %4 : vector<16x384xf32>
    %6 = vector.extract_strided_slice %5 {offsets = [0, 0], sizes = [16, 128], strides = [1, 1]} : vector<16x384xf32> to vector<16x128xf32>
    %7 = vector.shape_cast %6 : vector<16x128xf32> to vector<2x8x128xf32>
    %8 = vector.extract_strided_slice %5 {offsets = [0, 128], sizes = [16, 128], strides = [1, 1]} : vector<16x384xf32> to vector<16x128xf32>
    %9 = vector.shape_cast %8 : vector<16x128xf32> to vector<2x8x128xf32>
    %10 = vector.extract_strided_slice %5 {offsets = [0, 256], sizes = [16, 128], strides = [1, 1]} : vector<16x384xf32> to vector<16x128xf32>
    %11 = vector.shape_cast %10 : vector<16x128xf32> to vector<2x8x128xf32>
    "tpu.trace_start"() <{level = 10 : i32, message = "bqd,bkd->bqk"}> : () -> ()
    %cst_5 = arith.constant dense<0.000000e+00> : vector<2x8x8xf32>
    %12 = tpu.matmul %7, %9, %cst_5 {dimension_numbers = #tpu.dot_dimension_numbers<[2], [2], [1], [1], [0, 0, 0, 1, 1, 1], [0], [0]>} : vector<2x8x128xf32>, vector<2x8x128xf32>, vector<2x8x8xf32> -> vector<2x8x8xf32>
    "tpu.trace_stop"() : () -> ()
    %cst_6 = arith.constant dense<0xFF800000> : vector<2x8xf32>
    %13 = vector.multi_reduction <maximumf>, %12, %cst_6 [2] : vector<2x8x8xf32> to vector<2x8xf32>
    %14 = vector.shape_cast %13 : vector<2x8xf32> to vector<2x8x1xf32>
    %15 = vector.broadcast %14 : vector<2x8x1xf32> to vector<2x8x8xf32>
    %16 = arith.subf %12, %15 : vector<2x8x8xf32>
    %17 = math.exp %16 : vector<2x8x8xf32>
    %cst_7 = arith.constant dense<0.000000e+00> : vector<2x8xf32>
    %18 = vector.multi_reduction <add>, %17, %cst_7 [2] : vector<2x8x8xf32> to vector<2x8xf32>
    %19 = vector.shape_cast %18 : vector<2x8xf32> to vector<2x8x1xf32>
    %20 = tpu.reciprocal %19 : vector<2x8x1xf32> -> vector<2x8x1xf32>
    %21 = vector.broadcast %20 : vector<2x8x1xf32> to vector<2x8x8xf32>
    %22 = arith.mulf %17, %21 : vector<2x8x8xf32>
    "tpu.trace_start"() <{level = 10 : i32, message = "bqk,bkd->bqd"}> : () -> ()
    %cst_8 = arith.constant dense<0.000000e+00> : vector<2x8x128xf32>
    %23 = tpu.matmul %22, %11, %cst_8 {dimension_numbers = #tpu.dot_dimension_numbers<[2], [1], [1], [2], [0, 0, 0, 1, 1, 2], [0], [0]>} : vector<2x8x8xf32>, vector<2x8x128xf32>, vector<2x8x128xf32> -> vector<2x8x128xf32>
    "tpu.trace_stop"() : () -> ()
    %24 = vector.shape_cast %23 : vector<2x8x128xf32> to vector<16x128xf32>
    %c0_9 = arith.constant 0 : index
    %c0_10 = arith.constant 0 : index
    %c0_11 = arith.constant 0 : index
    %25 = vector.load %arg4[%c0_9, %c0_10, %c0_11] : memref<2x128x32xf32, #tpu.memory_space<vmem>>, vector<1x128x32xf32>
    %26 = vector.shape_cast %25 : vector<1x128x32xf32> to vector<128x32xf32>
    %cst_12 = arith.constant dense<0.000000e+00> : vector<16x32xf32>
    %27 = tpu.matmul %24, %26, %cst_12 {dimension_numbers = #tpu.dot_dimension_numbers<[1], [0], [0], [1], [0, 0, 1, 1], [], []>} : vector<16x128xf32>, vector<128x32xf32>, vector<16x32xf32> -> vector<16x32xf32>
    %c0_13 = arith.constant 0 : index
    %c0_14 = arith.constant 0 : index
    %28 = vector.load %arg5[%c0_13, %c0_14] : memref<3x128xf32, #tpu.memory_space<vmem>>, vector<1x32xf32>
    %29 = vector.broadcast %28 : vector<1x32xf32> to vector<16x32xf32>
    %30 = arith.addf %27, %29 : vector<16x32xf32>
    %c0_15 = arith.constant 0 : index
    %c0_16 = arith.constant 0 : index
    %31 = vector.load %arg3[%c0_15, %c0_16] : memref<32x128xf32, #tpu.memory_space<vmem>>, vector<32x128xf32>
    %cst_17 = arith.constant dense<0.000000e+00> : vector<16x128xf32>
    %32 = tpu.matmul %30, %31, %cst_17 {dimension_numbers = #tpu.dot_dimension_numbers<[1], [0], [0], [1], [0, 0, 1, 1], [], []>} : vector<16x32xf32>, vector<32x128xf32>, vector<16x128xf32> -> vector<16x128xf32>
    %c1 = arith.constant 1 : index
    %c0_18 = arith.constant 0 : index
    %33 = vector.load %arg5[%c1, %c0_18] : memref<3x128xf32, #tpu.memory_space<vmem>>, vector<1x128xf32>
    %34 = vector.broadcast %33 : vector<1x128xf32> to vector<16x128xf32>
    %35 = arith.addf %32, %34 : vector<16x128xf32>
    %cst_19 = arith.constant 0.000000e+00 : f32
    %36 = vector.broadcast %cst_19 : f32 to vector<16x128xf32>
    %37 = arith.maximumf %35, %36 : vector<16x128xf32>
    %c1_20 = arith.constant 1 : index
    %c0_21 = arith.constant 0 : index
    %c0_22 = arith.constant 0 : index
    %38 = vector.load %arg4[%c1_20, %c0_21, %c0_22] : memref<2x128x32xf32, #tpu.memory_space<vmem>>, vector<1x128x32xf32>
    %39 = vector.shape_cast %38 : vector<1x128x32xf32> to vector<128x32xf32>
    %cst_23 = arith.constant dense<0.000000e+00> : vector<16x32xf32>
    %40 = tpu.matmul %37, %39, %cst_23 {dimension_numbers = #tpu.dot_dimension_numbers<[1], [0], [0], [1], [0, 0, 1, 1], [], []>} : vector<16x128xf32>, vector<128x32xf32>, vector<16x32xf32> -> vector<16x32xf32>
    %c2 = arith.constant 2 : index
    %c0_24 = arith.constant 0 : index
    %41 = vector.load %arg5[%c2, %c0_24] : memref<3x128xf32, #tpu.memory_space<vmem>>, vector<1x32xf32>
    %42 = vector.broadcast %41 : vector<1x32xf32> to vector<16x32xf32>
    %43 = arith.addf %40, %42 : vector<16x32xf32>
    %c0_25 = arith.constant 0 : index
    %c0_26 = arith.constant 0 : index
    %44 = vector.load %arg6[%c0_25, %c0_26] : memref<16x32xf32, #tpu.memory_space<vmem>>, vector<16x32xf32>
    tpu.vector_store %arg6[%c0_25, %c0_26], %43 {strides = array<i32>} : memref<16x32xf32, #tpu.memory_space<vmem>>, vector<16x32xf32>,
    return
  }
}

</mosaic_0001>

<bundles_post_ra>
// kernel: encoder_forward.1
= control target key start
LH: loop header
LB: loop body
LE: loop exit
PB: predicated region body
PF: predicated region fallthrough
CT: control target
= control target key end

     0   :  { %v1146_v7 = vmov 0.0   ;;  %s1378_s0 = inlined_call_operand.vmem [shape: f32[16,32], index: 0, kind: input, shape index: {}]   ;;  %s1379_s1 = inlined_call_operand.vmem [shape: f32[32,384], index: 1, kind: input, shape index: {}]   ;;  %s1380_s2 = inlined_call_operand.vmem [shape: f32[1,384], index: 2, kind: input, shape index: {}]   ;;  %s1381_s3 = inlined_call_operand.vmem [shape: f32[32,128], index: 3, kind: input, shape index: {}]   ;;  %s1382_s4 = inlined_call_operand.vmem [shape: f32[2,128,32], index: 4, kind: input, shape index: {}]   ;;  %s1383_s5 = inlined_call_operand.vmem [shape: f32[3,128], index: 5, kind: input, shape index: {}]   ;;  %s1384_s6 = inlined_call_operand.hbm [shape: f32[16,32], index: 6, kind: output, shape index: {}]  }
   0x1   :  { %v27_v0 = vld [vmem:[%s1379_s1 + $0x8] sm:$0xff]  ;;  %v30_v1 = vld [vmem:[%s1379_s1 + $0x20] sm:$0xff]  ;;  %v29_v4 = vld [vmem:[%s1379_s1 + $0x18] sm:$0xff]  ;;  %126 = vmatprep.mubr.f32.mxu1 %v1146_v7  ;;  %920 = vmatprep.subr.mxu0 %v1146_v7 }
   0x2   :  { %v26_v2 = vld [vmem:[%s1379_s1] sm:$0xff]  ;;  %v1021_v3 = vpack.c.bf16 %v30_v1, %v27_v0  ;;  %v33_v5 = vld [vmem:[%s1379_s1 + $0x38] sm:$0xff]  ;;  %v36_v6 = vld [vmem:[%s1379_s1 + $0x50] sm:$0xff] }
   0x3   :  { %v1023_v8 = vpack.c.bf16 %v29_v4, %v26_v2  ;;  %v1025_v9 = vpack.c.bf16 %v36_v6, %v33_v5  ;;  %v32_v10 = vld [vmem:[%s1379_s1 + $0x30] sm:$0xff]  ;;  %v35_v11 = vld [vmem:[%s1379_s1 + $0x48] sm:$0xff] }
   0x4   :  { %1022 = vmatprep.subr.bf16.mxu1 %v1021_v3 }
   0x5   :  { %11 = vsyncpa [#allocation3], 0  ;;  %1024 = vmatpush1.bf16.msra.mxu1 %v1023_v8  ;;  %v1027_v12 = vpack.c.bf16 %v35_v11, %v32_v10  ;;  %v24_v13 = vld [vmem:[%s1378_s0] sm:$0xff]  ;;  %vm55_vm0 = vcmask 261120   ;;  %v25_v14 = vld [vmem:[%s1378_s0 + $0x8] sm:$0xff]  ;;  %vm1147_vm1 = vmmov 0   ;;  %v40_v15 = vlaneseq }
   0x6   :  { %1026 = vmatprep.subr.bf16.mxu1 %v1025_v9  ;;  %922 = vmatprep.mubr.msk.f32.mxu0 %vm1147_vm1, %v1146_v7  ;;  %v38_v18 = vld [vmem:[%s1380_s2] sm:$0x7]  ;;  %v28_v30 = vld [vmem:[%s1379_s1 + $0x10] sm:$0xff]  ;;  %v31_v31 = vld [vmem:[%s1379_s1 + $0x28] sm:$0xff]  ;;  %vm354_vm2 = vcmask 64512  }
   0x7   :  { %v41_v16 = vshrl.u32 %v40_v15, 7  ;;  %v34_v32 = vld [vmem:[%s1379_s1 + $0x40] sm:$0xff]  ;;  %v1029_v33 = vpack.c.bf16 %v31_v31, %v28_v30  ;;  %v37_v34 = vld [vmem:[%s1379_s1 + $0x58] sm:$0xff]  ;;  %v524_v59 = vld [vmem:[%s1382_s4 + $0x8] sm:$0xff] }
   0x8   :  { %v1033_v35 = vpack.c.bf16 %v37_v34, %v34_v32  ;;  %v523_v58 = vld [vmem:[%s1382_s4] sm:$0xff]  ;;  %v525_v63 = vld [vmem:[%s1382_s4 + $0x10] sm:$0xff]  ;;  %v526_v0 = vld [vmem:[%s1382_s4 + $0x18] sm:$0xff] }
   0x9   :  { %1028 = vmatpush1.bf16.msra.mxu1 %v1027_v12  ;;  %v46_v17 = vsub.s32 1, %v41_v16  ;;  %v42_v19 = vsub.s32 0, %v41_v16  ;;  %v50_v52 = vsub.s32 2, %v41_v16  ;;  %v1037_v60 = vpack.c.bf16 %v524_v59, %v523_v58  ;;  %v527_v4 = vld [vmem:[%s1382_s4 + $0x20] sm:$0xff]  ;;  %v528_v5 = vld [vmem:[%s1382_s4 + $0x28] sm:$0xff]  ;;  %v529_v9 = vld [vmem:[%s1382_s4 + $0x30] sm:$0xff] }
   0xa   :  { %1030 = vmatprep.subr.bf16.mxu1 %v1029_v33  ;;  %v1041_v3 = vpack.c.bf16 %v526_v0, %v525_v63  ;;  %v1045_v8 = vpack.c.bf16 %v528_v5, %v527_v4  ;;  %v530_v10 = vld [vmem:[%s1382_s4 + $0x38] sm:$0xff]  ;;  %v531_v12 = vld [vmem:[%s1382_s4 + $0x40] sm:$0xff]  ;;  %v533_v15 = vld [vmem:[%s1382_s4 + $0x50] sm:$0xff] }
   0xb   :  { %v47_v20 = vrot.slane %v38_v18, %v46_v17  ;;  %v43_v22 = vrot.slane %v38_v18, %v42_v19  ;;  %v51_v53 = vrot.slane %v38_v18, %v50_v52  ;;  %v1049_v11 = vpack.c.bf16 %v530_v10, %v529_v9  ;;  %v534_v16 = vld [vmem:[%s1382_s4 + $0x58] sm:$0xff]  ;;  %v535_v18 = vld [vmem:[%s1382_s4 + $0x60] sm:$0xff]  ;;  %v536_v19 = vld [vmem:[%s1382_s4 + $0x68] sm:$0xff] }
   0xc   :  { %826 = vmatmul.mubr.msk.f32.vlgmr.msra.gmra.mrb[0].mxu1 %vm55_vm0, %v24_v13  ;;  %v1057_v17 = vpack.c.bf16 %v534_v16, %v533_v15  ;;  %v621_v31 = vld [vmem:[%s1381_s3 + $0x10] sm:$0xff]  ;;  %v622_v32 = vld [vmem:[%s1381_s3 + $0x18] sm:$0xff]  ;;  %v836_v34 = vld [vmem:[%s1382_s4 + $0x80] sm:$0xff] }
   0xd   :  { %132 = vmatprep.mubr.f32.mxu1 %v1146_v7  ;;  %1032 = vmatpush3.bf16.msra.mxu1 %v1029_v33  ;;  %v1073_v33 = vpack.c.bf16 %v622_v32, %v621_v31  ;;  %v845_v52 = vld [vmem:[%s1382_s4 + $0xc8] sm:$0xff]  ;;  %v833_v63 = vld [vmem:[%s1383_s5 + $0x1] ss:$0 sm:$0xff] }
   0xe   :  { %1034 = vmatprep.subr.bf16.mxu1 %v1033_v35  ;;  %v849_v58 = vld [vmem:[%s1382_s4 + $0xe8] sm:$0xff] }
  0x10   :  { %827 = vmatmul.mubr.msk.f32.gmra.mrb[2].mxu1 %vm55_vm0, %v25_v14 }
  0x11   :  { %917 = vmatprep.mubr.msk.f32.mxu1 %vm55_vm0, %v24_v13  ;;  %1036 = vmatpush3.bf16.msra.mxu1 %v1033_v35  ;;  %v532_v13 = vld [vmem:[%s1382_s4 + $0x48] sm:$0xff] }
  0x12   :  { %930 = vmatprep.subr.mxu1 %v1146_v7  ;;  %v837_v35 = vld [vmem:[%s1382_s4 + $0x88] sm:$0xff] }
  0x14   :  { %918 = vmatmul.mubr.msk.f32.vlgmr.msra.gmra.mrb[4].mxu1 %vm55_vm0, %v25_v14  ;;  %v1053_v14 = vpack.c.bf16 %v532_v13, %v531_v12 }
  0x15   :  { %932 = vmatprep.mubr.msk.f32.mxu1 %vm1147_vm1, %v1146_v7 }
  0xdf   :  { %v128_v21 = vpop.f32.mrb[0].mxu1 }
  0xe0   :  { %v130_v23 = vpop.f32.mrb[1].mxu1  ;;  %v129_v26 = vadd.f32 %v128_v21, %v43_v22  ;;  %v537_v21 = vld [vmem:[%s1382_s4 + $0x70] sm:$0xff] }
  0xe1   :  { %v131_v24 = vadd.f32 %v130_v23, %v47_v20 }
  0xe3   :  { %v134_v25 = vpop.f32.mrb[2].mxu1  ;;  %921 = vmatpush3.xpose.msra.mxu0 %v131_v24  ;;  %v619_v24 = vld [vmem:[%s1381_s3] sm:$0xff] }
  0xe4   :  { %v136_v27 = vpop.f32.mrb[3].mxu1  ;;  %925 = vmatprep.subr.mxu0 %v1146_v7  ;;  %v135_v29 = vadd.f32 %v134_v25, %v43_v22  ;;  %v538_v22 = vld [vmem:[%s1382_s4 + $0x78] sm:$0xff]  ;;  %v620_v25 = vld [vmem:[%s1381_s3 + $0x8] sm:$0xff] }
  0xe5   :  { %v137_v28 = vadd.f32 %v136_v27, %v47_v20  ;;  %v1061_v20 = vpack.c.bf16 %v536_v19, %v535_v18  ;;  %v1065_v23 = vpack.c.bf16 %v538_v22, %v537_v21 }
  0xe6   :  { %923 = vmatmul.mubr.f32.vlgmr.msra.gmra.mrb[0].mxu0 %v129_v26  ;;  %v1069_v26 = vpack.c.bf16 %v620_v25, %v619_v24 }
  0xe7   :  { %926 = vmatpush3.xpose.msra.mxu0 %v137_v28  ;;  %927 = vmatprep.mubr.msk.f32.mxu0 %vm1147_vm1, %v1146_v7  ;;  %v919_v54 = vpop.f32.mrb[4].mxu1 }
  0xe8   :  { %935 = vmatprep.subr.mxu0 %v1146_v7  ;;  %v205_v55 = vpop.f32.mrb[5].mxu1  ;;  %v211_v57 = vadd.f32 %v919_v54, %v51_v53  ;;  %v846_v54 = vld [vmem:[%s1382_s4 + $0xd0] sm:$0xff] }
  0xe9   :  { %v206_v56 = vadd.f32 %v205_v55, %v51_v53  ;;  %v847_v55 = vld [vmem:[%s1382_s4 + $0xd8] sm:$0xff] }
  0xea   :  { %928 = vmatmul.mubr.f32.vlgmr.msra.gmra.mrb[2].mxu0 %v135_v29 }
  0xeb   :  { %937 = vmatprep.mubr.msk.f32.mxu0 %vm1147_vm1, %v1146_v7  ;;  %931 = vmatpush3.msra.mxu1 %v206_v56  ;;  %v1097_v56 = vpack.c.bf16 %v847_v55, %v846_v54 }
  0xec   :  { %936 = vmatpush3.msra.mxu0 %v211_v57  ;;  %1038 = vmatprep.subr.bf16.mxu1 %v1037_v60  ;;  %v848_v57 = vld [vmem:[%s1382_s4 + $0xe0] sm:$0xff] }
  0xed   :  { %1070 = vmatprep.subr.bf16.mxu0 %v1069_v26  ;;  %v1101_v59 = vpack.c.bf16 %v849_v58, %v848_v57 }
 0x1b9   :  { %v280_v36 = vpop.f32.mrb[0].mxu0 }
 0x1ba   :  { %v924_v37 = vpop.f32.mrb[1].mxu0  ;;  %v355_v38 = vsel %vm354_vm2, %v280_v36, -inf }
 0x1bb   :  { %356 = vmax.xlane.f32.xlu0 %v355_v38  ;;  %v832_v37 = vld [vmem:[%s1383_s5] ss:$0 sm:$0xff] }
 0x1bd   :  { %v350_v39 = vpop.f32.mrb[2].mxu0 }
 0x1be   :  { %v929_v40 = vpop.f32.mrb[3].mxu0  ;;  %v358_v41 = vsel %vm354_vm2, %v350_v39, -inf }
 0x1bf   :  { %359 = vmax.xlane.f32.xlu0 %v358_v41  ;;  %v839_v40 = vld [vmem:[%s1382_s4 + $0x98] sm:$0xff] }
 0x248   :  { %v357_v42 = vpop.xlane.xlu0 %356 }
 0x249   :  { %v361_v43 = vsub.f32 %v280_v36, %v357_v42  ;;  %v1077_v36 = vpack.c.bf16 %v837_v35, %v836_v34 }
 0x24b   :  { %v363_v44 = vmul.f32 1.442695, %v361_v43 }
 0x24c   :  { %v360_v45 = vpop.xlane.xlu0 %359 }
 0x24d   :  { %1114 = vpow2.f32 %v363_v44  ;;  %v362_v46 = vsub.f32 %v350_v39, %v360_v45  ;;  %v838_v39 = vld [vmem:[%s1382_s4 + $0x90] sm:$0xff]  ;;  %v840_v45 = vld [vmem:[%s1382_s4 + $0xa0] sm:$0xff] }
 0x24e   :  { %v1081_v44 = vpack.c.bf16 %v839_v40, %v838_v39 }
 0x24f   :  { %v365_v47 = vmul.f32 1.442695, %v362_v46  ;;  %v841_v46 = vld [vmem:[%s1382_s4 + $0xa8] sm:$0xff] }
 0x251   :  { %1116 = vpow2.f32 %v365_v47  ;;  %v1085_v47 = vpack.c.bf16 %v841_v46, %v840_v45 }
 0x257   :  { %v1115_v48 = vpop.eup %1114 }
 0x258   :  { %v367_v49 = vsel %vm354_vm2, %v1115_v48, 0.0 }
 0x259   :  { %368 = vadd.xlane.f32.xlu1 %v367_v49  ;;  %v843_v49 = vld [vmem:[%s1382_s4 + $0xb8] sm:$0xff] }
 0x25b   :  { %v1117_v50 = vpop.eup %1116 }
 0x25c   :  { %v370_v51 = vsel %vm354_vm2, %v1117_v50, 0.0 }
 0x25d   :  { %371 = vadd.xlane.f32.xlu1 %v370_v51  ;;  %v844_v51 = vld [vmem:[%s1382_s4 + $0xc0] sm:$0xff] }
 0x25e   :  { %v1093_v53 = vpack.c.bf16 %v845_v52, %v844_v51 }
 0x2e6   :  { %v369_v61 = vpop.xlane.xlu1 %368 }
 0x2e7   :  { %1118 = vrcp.f32 %v369_v61  ;;  %v851_v61 = vld [vmem:[%s1382_s4 + $0xf8] sm:$0xff] }
 0x2ea   :  { %v372_v62 = vpop.xlane.xlu1 %371 }
 0x2eb   :  { %1120 = vrcp.f32 %v372_v62 }
 0x2f1   :  { %v1119_v1 = vpop.eup %1118 }
 0x2f2   :  { %v375_v2 = vmul.f32 %v1119_v1, %v1115_v48  ;;  %v842_v48 = vld [vmem:[%s1382_s4 + $0xb0] sm:$0xff] }
 0x2f4   :  { %933 = vmatmul.mubr.msk.f32.vlgmr.msra.gmra.mrb[6].mxu1 %vm354_vm2, %v375_v2 }
 0x2f5   :  { %v1121_v6 = vpop.eup %1120  ;;  %1040 = vmatpush3.bf16.msra.mxu1 %v1037_v60  ;;  %v850_v60 = vld [vmem:[%s1382_s4 + $0xf0] sm:$0xff]  ;;  %s1148_s4 = smov [#allocation2]  }
 0x2f6   :  { %v376_v7 = vmul.f32 %v1121_v6, %v1117_v50  ;;  %1042 = vmatprep.subr.bf16.mxu1 %v1041_v3  ;;  %v1089_v50 = vpack.c.bf16 %v843_v49, %v842_v48  ;;  %v1105_v62 = vpack.c.bf16 %v851_v61, %v850_v60  ;;  %v852_v6 = vld [vmem:[%s1383_s5 + $0x2] ss:$0 sm:$0xff]  ;;  %s815_s20 = sshll.u32 %s1148_s4, 4  ;;  %s816_s20 = int_to_ptr.vmem [resolvable:$true] %s815_s20 }
 0x2f7   :  { %s1122_s21 = scalar_lea.vmem %s816_s20, 256  ;;  %p1127_p1 = scmp.lt.s32.totalorder %s816_s20, %s816_s20 }
 0x2f8   :  { %938 = vmatmul.mubr.msk.f32.vlgmr.msra.gmra.mrb[4].mxu0 %vm354_vm2, %v376_v7  ;;  %p1123_p0 = scmp.ne.s32.totalorder %s816_s20, %s1122_s21  ;;  %p1128_p2 = scmp.lt.s32.totalorder %s1122_s21, %s1122_s21 }
 0x2f9   :  { %1044 = vmatpush3.bf16.msra.mxu1 %v1041_v3  ;;  %1072 = vmatpush3.bf16.msra.mxu0 %v1069_v26 }
 0x2fa   :  { %1046 = vmatprep.subr.bf16.mxu1 %v1045_v8  ;;  %1074 = vmatprep.subr.bf16.mxu0 %v1073_v33  ;;  %p1129_p3 = por %p1128_p2, %p1127_p1 }
 0x2fc   :  { %p1130_p4 = pnand %p1129_p3, %p1123_p0 }
 0x2fd   :  { %1048 = vmatpush3.bf16.msra.mxu1 %v1045_v8  ;;  %1076 = vmatpush3.bf16.msra.mxu0 %v1073_v33 }
 0x2fe   :  { %1050 = vmatprep.subr.bf16.mxu1 %v1049_v11  ;;  %1078 = vmatprep.subr.bf16.mxu0 %v1077_v36 }
 0x301   :  { %1052 = vmatpush3.bf16.msra.mxu1 %v1049_v11 }
 0x302   :  { %1054 = vmatprep.subr.bf16.mxu1 %v1053_v14 }
 0x305   :  { %1056 = vmatpush3.bf16.msra.mxu1 %v1053_v14 }
 0x306   :  { %1058 = vmatprep.subr.bf16.mxu1 %v1057_v17 }
 0x309   :  { %1060 = vmatpush3.bf16.msra.mxu1 %v1057_v17 }
 0x30a   :  { %1062 = vmatprep.subr.bf16.mxu1 %v1061_v20 }
 0x30d   :  { %1064 = vmatpush3.bf16.msra.mxu1 %v1061_v20 }
 0x30e   :  { %1066 = vmatprep.subr.bf16.mxu1 %v1065_v23 }
 0x311   :  { %1068 = vmatpush3.bf16.msra.mxu1 %v1065_v23 }
 0x3c7   :  { %v446_v27 = vpop.f32.mrb[6].mxu1 }
 0x3c8   :  { %v934_v28 = vpop.f32.mrb[7].mxu1  ;;  %972 = vmatprep.mubr.f32.mxu1 %v446_v27 }
 0x3cb   :  { %v519_v29 = vpop.f32.mrb[4].mxu0 }
 0x3cc   :  { %v939_v30 = vpop.f32.mrb[5].mxu0  ;;  %973 = vmatmul.mubr.f32.vlgmr.msra.gmra.mrb[8].mxu1 %v519_v29 }
 0x49f   :  { %v974_v38 = vpop.f32.mrb[8].mxu1 }
 0x4a0   :  { %v610_v41 = vpop.f32.mrb[9].mxu1  ;;  %v616_v43 = vadd.f32 %v974_v38, %v832_v37 }
 0x4a1   :  { %v611_v42 = vadd.f32 %v832_v37, %v610_v41 }
 0x4a3   :  { %983 = vmatprep.mubr.msk.f32.mxu0 %vm55_vm0, %v611_v42 }
 0x4a4   :  { %984 = vmatmul.mubr.msk.f32.vlgmr.msra.gmra.mrb[6].mxu0 %vm55_vm0, %v616_v43 }
 0x4a5   :  { %1080 = vmatpush3.bf16.msra.mxu0 %v1077_v36 }
 0x4a6   :  { %1082 = vmatprep.subr.bf16.mxu0 %v1081_v44 }
 0x4a9   :  { %1084 = vmatpush3.bf16.msra.mxu0 %v1081_v44 }
 0x4aa   :  { %1086 = vmatprep.subr.bf16.mxu0 %v1085_v47 }
 0x4ad   :  { %1088 = vmatpush3.bf16.msra.mxu0 %v1085_v47 }
 0x4ae   :  { %1090 = vmatprep.subr.bf16.mxu0 %v1089_v50 }
 0x4b1   :  { %1092 = vmatpush3.bf16.msra.mxu0 %v1089_v50 }
 0x4b2   :  { %1094 = vmatprep.subr.bf16.mxu0 %v1093_v53 }
 0x4b5   :  { %1096 = vmatpush3.bf16.msra.mxu0 %v1093_v53 }
 0x4b6   :  { %1098 = vmatprep.subr.bf16.mxu0 %v1097_v56 }
 0x4b9   :  { %1100 = vmatpush3.bf16.msra.mxu0 %v1097_v56 }
 0x4ba   :  { %1102 = vmatprep.subr.bf16.mxu0 %v1101_v59 }
 0x4bd   :  { %1104 = vmatpush3.bf16.msra.mxu0 %v1101_v59 }
 0x4be   :  { %1106 = vmatprep.subr.bf16.mxu0 %v1105_v62 }
 0x4c1   :  { %1108 = vmatpush3.bf16.msra.mxu0 %v1105_v62 }
 0x577   :  { %v985_v0 = vpop.f32.mrb[6].mxu0 }
 0x578   :  { %v706_v1 = vadd.f32 %v985_v0, %v833_v63  ;;  %v700_v2 = vpop.f32.mrb[7].mxu0 }
 0x579   :  { %v701_v3 = vadd.f32 %v833_v63, %v700_v2 }
 0x57a   :  { %v710_v5 = vmax.f32 %v706_v1, 0.0 }
 0x57b   :  { %v709_v4 = vmax.f32 %v701_v3, 0.0 }
 0x57d   :  { %1018 = vmatprep.mubr.f32.mxu0 %v709_v4 }
 0x57e   :  { %1019 = vmatmul.mubr.f32.vlgmr.msra.gmra.mrb[8].mxu0 %v710_v5 }
 0x651   :  { %v1020_v7 = vpop.f32.mrb[8].mxu0 }
 0x652   :  { %v805_v8 = vadd.f32 %v1020_v7, %v852_v6  ;;  %v799_v9 = vpop.f32.mrb[9].mxu0 }
 0x653   :  { %v800_v10 = vadd.f32 %v852_v6, %v799_v9 }
 0x654   :  { %809 = vst.msk [vmem:[#allocation2 + $0x8] sm:$0xff] %vm55_vm0, %v805_v8 }
 0x655   :  { %808 = vst.msk [vmem:[#allocation2] sm:$0xff] %vm55_vm0, %v800_v10 }
 0x656   :  { %1133 = shalt.err (!%p1130_p4)
}
 0x657   :  { %s1134_s23 = scalar_lea.hbm %s1384_s6, 256 }
 0x658   :  { %p1135_p5 = scmp.ne.s32.totalorder %s1384_s6, %s1134_s23  ;;  %p1138_p6 = scmp.lt.u32.totalorder %s1134_s23, %s1384_s6 }
 0x65a   :  { %p1140_p7 = pnand %p1138_p6, %p1135_p5 }
 0x65c   :  { %1143 = shalt.err (!%p1140_p7)
}
 0x65d   :  { %s1149_s27 = smov 128   ;;  %s1150_s28 = smov 8  }
 0x65e   :  { %821 = dma.vmem_to_hbm [thread:$0]  %s816_s20, 256, %s1384_s6, [#allocation3], %s1149_s27, %s1149_s27, %s1150_s28  }
 0x65f   :  { %1144 = dma.done.wait [#allocation3], 256  }
 0x660   :  { %1145 = vsyncadd [#allocation3], 4294967040 }
 0x661   :  { %825 = vsyncpa [#allocation3], 1 }

</bundles_post_ra>
